<compile_context>
chip_gen: v7x
topology: tpu7x:2x2x1
jax: 0.10.0
libtpu: 0.0.40
codegen_flags: <defaults>
</compile_context>

<pallas_src>
import functools

import jax
import jax.numpy as jnp
from jax.experimental import pallas as pl
from jax.experimental.pallas import tpu as pltpu


def _round_up(x, m):
    return ((x + m - 1) // m) * m


def _concat_linear_kernel(obs_ref, hid_ref, w_obs_ref, w_hid_ref, b_ref, out_ref):
    # out = obs @ W_obs + hid @ W_hid + b   (== cat(obs, hid) @ W.T + b)
    acc = jnp.dot(obs_ref[...], w_obs_ref[...], preferred_element_type=jnp.float32)
    acc = acc + jnp.dot(hid_ref[...], w_hid_ref[...],
                        preferred_element_type=jnp.float32)
    out_ref[...] = (acc + b_ref[...]).astype(out_ref.dtype)


def prepare_concat_linear_params(weight, bias, dim_obs, *, param_dtype=jnp.float32):
    """One-time parameter layout: split, transpose and lane-pad the Linear weight.

    Args:
      weight: f32[D_out, D_obs + D_hid]  (PyTorch nn.Linear layout)
      bias:   f32[D_out]
      dim_obs: D_obs (where to split the in-features)

    Returns:
      (w_obs [D_obs, N_pad], w_hid [D_hid, N_pad], bias_p [1, N_pad], d_out)
      with N_pad = round_up(D_out, 128).
    """
    d_out, d_in = weight.shape
    assert dim_obs < d_in, "dim_obs must be smaller than the Linear in-features"
    n_pad = _round_up(d_out, 128)
    pad_cols = n_pad - d_out

    w_t = weight.T.astype(param_dtype)                 # [D_in, D_out]
    w_obs = jnp.pad(w_t[:dim_obs], ((0, 0), (0, pad_cols)))
    w_hid = jnp.pad(w_t[dim_obs:], ((0, 0), (0, pad_cols)))
    bias_p = jnp.pad(bias.astype(jnp.float32), (0, pad_cols)).reshape(1, n_pad)
    return w_obs, w_hid, bias_p, d_out


def _choose_tile_b(batch, d_obs, d_hid, n_pad, in_bytes, block_b):
    """Largest batch tile (multiple of 8, <= block_b) whose double-buffered
    footprint fits a conservative VMEM budget (safe on every generation)."""
    budget = 12 * 1024 * 1024  # below v5e's 16 MiB default scoped VMEM

    def footprint(t):
        stream = 2 * t * ((d_obs + d_hid) * in_bytes + n_pad * 4)   # dbl-buffered tiles
        resident = 2 * ((d_obs + d_hid) * n_pad + n_pad) * 4        # weights + bias
        return stream + resident

    tb = min(block_b, _round_up(batch, 8))
    tb = _round_up(tb, 8)
    while tb > 8 and footprint(tb) > budget:
        tb = _round_up(tb // 2, 8)
    return max(tb, 8), footprint(max(tb, 8))


def concat_flattened_observation_and_lerped_hidden(
    flattened_obs,
    lerped_hidden,
    w_obs,
    w_hid,
    bias_p,
    d_out,
    *,
    block_b=1024,
    input_dtype=None,
):
    """Fused forward of ConcatFlattenedObservationAndLerpedHidden.

    Args:
      flattened_obs: f32[*, D_obs]
      lerped_hidden: f32[*, D_hid]
      w_obs, w_hid, bias_p, d_out: outputs of prepare_concat_linear_params
      block_b: max batch tile (rows); multiple of 8
      input_dtype: optional dtype (e.g. jnp.bfloat16) to cast the streaming
                   inputs to — halves HBM read bytes on v6e/v7x.

    Returns:
      f32[*, D_out]
    """
    *lead, d_obs = flattened_obs.shape
    d_hid = lerped_hidden.shape[-1]
    n_pad = w_obs.shape[-1]
    assert w_obs.shape[0] == d_obs and w_hid.shape[0] == d_hid

    obs2 = flattened_obs.reshape(-1, d_obs)
    hid2 = lerped_hidden.reshape(-1, d_hid)
    if input_dtype is not None:
        obs2 = obs2.astype(input_dtype)
        hid2 = hid2.astype(input_dtype)
    batch = obs2.shape[0]
    in_bytes = jnp.dtype(obs2.dtype).itemsize

    tb, fp_bytes = _choose_tile_b(batch, d_obs, d_hid, n_pad, in_bytes, block_b)
    grid = (pl.cdiv(batch, tb),)   # no row padding; Pallas masks the tail block

    cost = pl.CostEstimate(
        flops=2 * batch * (d_obs + d_hid) * n_pad,
        transcendentals=0,
        bytes_accessed=(obs2.size * in_bytes + hid2.size * in_bytes
                        + 4 * (w_obs.size + w_hid.size + bias_p.size)
                        + 4 * batch * n_pad),
    )

    out_padded = pl.pallas_call(
        _concat_linear_kernel,
        out_shape=jax.ShapeDtypeStruct((batch, n_pad), jnp.float32),
        grid=grid,
        in_specs=[
            pl.BlockSpec((tb, d_obs), lambda i: (i, 0)),     # obs tile (streamed)
            pl.BlockSpec((tb, d_hid), lambda i: (i, 0)),     # hidden tile (streamed)
            pl.BlockSpec((d_obs, n_pad), lambda i: (0, 0)),  # W_obs (VMEM-resident)
            pl.BlockSpec((d_hid, n_pad), lambda i: (0, 0)),  # W_hid (VMEM-resident)
            pl.BlockSpec((1, n_pad), lambda i: (0, 0)),      # bias   (VMEM-resident)
        ],
        out_specs=pl.BlockSpec((tb, n_pad), lambda i: (i, 0)),
        compiler_params=pltpu.CompilerParams(
            # On v7x, CORE_PARALLEL / an explicit core axis can be used to
            # guarantee 2-TC sharding; "parallel" is the portable choice here.
            dimension_semantics=("parallel",),
            vmem_limit_bytes=int(min(max(2 * fp_bytes, 4 << 20), 32 << 20)),
        ),
        cost_estimate=cost,
    )(obs2, hid2, w_obs, w_hid, bias_p)

    # Column slice back to the logical D_out.  A consumer that tolerates the
    # lane-padded slab should take out_padded directly and skip this pass.
    out = out_padded[:, :d_out]
    return out.reshape(*lead, d_out)


if __name__ == "__main__":
    D_OBS, D_HID, D_OUT = 48, 32, 24
    LEAD = (2, 4)   # arbitrary leading "(*)" dims, flattened inside the wrapper

    key = jax.random.PRNGKey(0)
    k_obs, k_hid, k_w, k_b = jax.random.split(key, 4)
    flattened_obs = jax.random.normal(k_obs, LEAD + (D_OBS,), jnp.float32)
    lerped_hidden = jax.random.normal(k_hid, LEAD + (D_HID,), jnp.float32)
    weight = 0.1 * jax.random.normal(k_w, (D_OUT, D_OBS + D_HID), jnp.float32)
    bias = 0.1 * jax.random.normal(k_b, (D_OUT,), jnp.float32)

    # One-time parameter layout (hoisted out of the per-call jitted path).
    w_obs, w_hid, bias_p, d_out = prepare_concat_linear_params(weight, bias, D_OBS)
    jax.block_until_ready((w_obs, w_hid, bias_p))

    fwd = jax.jit(functools.partial(
        concat_flattened_observation_and_lerped_hidden, d_out=d_out))
    out = fwd(flattened_obs, lerped_hidden, w_obs, w_hid, bias_p)
    jax.block_until_ready(out)

    # Reference: the literal concat-then-linear the PyTorch module performs.
    ref = jnp.concatenate([flattened_obs, lerped_hidden], axis=-1) @ weight.T + bias

    assert out.shape == LEAD + (D_OUT,)
    assert bool(jnp.all(jnp.isfinite(out)))
    assert bool(jnp.allclose(out, ref, atol=1e-5, rtol=1e-5))
    print("KERNEL_OK")
</pallas_src>

<mosaic_0001>
module attributes {stable_mosaic.version = 11 : i64} {
  func.func @_concat_linear_kernel(%arg0: i32, %arg1: memref<8x48xf32, #tpu.memory_space<vmem>>, %arg2: memref<8x32xf32, #tpu.memory_space<vmem>>, %arg3: memref<48x128xf32, #tpu.memory_space<vmem>>, %arg4: memref<32x128xf32, #tpu.memory_space<vmem>>, %arg5: memref<1x128xf32, #tpu.memory_space<vmem>>, %arg6: memref<8x128xf32, #tpu.memory_space<vmem>>) attributes {dimension_semantics = [#tpu.dimension_semantics<parallel>], iteration_bounds = array<i64: 1>, scalar_prefetch = 0 : i64, scratch_operands = 0 : i64, tpu.core_type = #tpu.core_type<tc>, window_params = [{transform_indices = @transform_0, window_bounds = array<i64: 8, 48>}, {transform_indices = @transform_1, window_bounds = array<i64: 8, 32>}, {pipeline_mode = #tpu.pipeline_mode<synchronous>, transform_indices = @transform_2, window_bounds = array<i64: 48, 128>}, {pipeline_mode = #tpu.pipeline_mode<synchronous>, transform_indices = @transform_3, window_bounds = array<i64: 32, 128>}, {pipeline_mode = #tpu.pipeline_mode<synchronous>, transform_indices = @transform_4, window_bounds = array<i64: 1, 128>}, {transform_indices = @transform_5, window_bounds = array<i64: 8, 128>}]} {
    %c0 = arith.constant 0 : index
    %c0_0 = arith.constant 0 : index
    %0 = vector.load %arg1[%c0, %c0_0] : memref<8x48xf32, #tpu.memory_space<vmem>>, vector<8x48xf32>
    %c0_1 = arith.constant 0 : index
    %c0_2 = arith.constant 0 : index
    %1 = vector.load %arg3[%c0_1, %c0_2] : memref<48x128xf32, #tpu.memory_space<vmem>>, vector<48x128xf32>
    %cst = arith.constant dense<0.000000e+00> : vector<8x128xf32>
    %2 = tpu.matmul %0, %1, %cst {dimension_numbers = #tpu.dot_dimension_numbers<[1], [0], [0], [1], [0, 0, 1, 1], [], []>} : vector<8x48xf32>, vector<48x128xf32>, vector<8x128xf32> -> vector<8x128xf32>
    %c0_3 = arith.constant 0 : index
    %c0_4 = arith.constant 0 : index
    %3 = vector.load %arg2[%c0_3, %c0_4] : memref<8x32xf32, #tpu.memory_space<vmem>>, vector<8x32xf32>
    %c0_5 = arith.constant 0 : index
    %c0_6 = arith.constant 0 : index
    %4 = vector.load %arg4[%c0_5, %c0_6] : memref<32x128xf32, #tpu.memory_space<vmem>>, vector<32x128xf32>
    %cst_7 = arith.constant dense<0.000000e+00> : vector<8x128xf32>
    %5 = tpu.matmul %3, %4, %cst_7 {dimension_numbers = #tpu.dot_dimension_numbers<[1], [0], [0], [1], [0, 0, 1, 1], [], []>} : vector<8x32xf32>, vector<32x128xf32>, vector<8x128xf32> -> vector<8x128xf32>
    %6 = arith.addf %2, %5 : vector<8x128xf32>
    %c0_8 = arith.constant 0 : index
    %c0_9 = arith.constant 0 : index
    %7 = vector.load %arg5[%c0_8, %c0_9] : memref<1x128xf32, #tpu.memory_space<vmem>>, vector<1x128xf32>
    %8 = vector.broadcast %7 : vector<1x128xf32> to vector<8x128xf32>
    %9 = arith.addf %6, %8 : vector<8x128xf32>
    %c0_10 = arith.constant 0 : index
    %c0_11 = arith.constant 0 : index
    %10 = vector.load %arg6[%c0_10, %c0_11] : memref<8x128xf32, #tpu.memory_space<vmem>>, vector<8x128xf32>
    tpu.vector_store %arg6[%c0_10, %c0_11], %9 {strides = array<i32>} : memref<8x128xf32, #tpu.memory_space<vmem>>, vector<8x128xf32>,
    return
  }
  func.func @transform_0(%arg0: i32) -> (i32, i32) {
    %c0_i32 = arith.constant 0 : i32
    %c0_i32_0 = arith.constant 0 : i32
    return %arg0, %c0_i32 : i32, i32
  }
  func.func @transform_1(%arg0: i32) -> (i32, i32) {
    %c0_i32 = arith.constant 0 : i32
    %c0_i32_0 = arith.constant 0 : i32
    return %arg0, %c0_i32 : i32, i32
  }
  func.func @transform_2(%arg0: i32) -> (i32, i32) {
    %c0_i32 = arith.constant 0 : i32
    %c0_i32_0 = arith.constant 0 : i32
    %c0_i32_1 = arith.constant 0 : i32
    return %c0_i32, %c0_i32_0 : i32, i32
  }
  func.func @transform_3(%arg0: i32) -> (i32, i32) {
    %c0_i32 = arith.constant 0 : i32
    %c0_i32_0 = arith.constant 0 : i32
    %c0_i32_1 = arith.constant 0 : i32
    return %c0_i32, %c0_i32_0 : i32, i32
  }
  func.func @transform_4(%arg0: i32) -> (i32, i32) {
    %c0_i32 = arith.constant 0 : i32
    %c0_i32_0 = arith.constant 0 : i32
    %c0_i32_1 = arith.constant 0 : i32
    return %c0_i32, %c0_i32_0 : i32, i32
  }
  func.func @transform_5(%arg0: i32) -> (i32, i32) {
    %c0_i32 = arith.constant 0 : i32
    %c0_i32_0 = arith.constant 0 : i32
    return %arg0, %c0_i32 : i32, i32
  }
}

</mosaic_0001>

<bundles_post_ra>
// kernel: concat_flattened_observation_and_lerped_hidden.1
= control target key start
LH: loop header
LB: loop body
LE: loop exit
PB: predicated region body
PF: predicated region fallthrough
CT: control target
= control target key end

     0   :  { %10 = vsyncpa [#allocation3], 0  ;;  %s503_s0 = inlined_call_operand.hbm [shape: f32[8,48], index: 0, kind: input, shape index: {}]   ;;  %s504_s1 = inlined_call_operand.vmem [shape: f32[8,32], index: 1, kind: input, shape index: {}]   ;;  %s505_s2 = inlined_call_operand.hbm [shape: f32[48,128], index: 2, kind: input, shape index: {}]   ;;  %s506_s3 = inlined_call_operand.hbm [shape: f32[32,128], index: 3, kind: input, shape index: {}]   ;;  %s507_s4 = inlined_call_operand.vmem [shape: f32[1,128], index: 4, kind: input, shape index: {}]   ;;  %s508_s5 = inlined_call_operand.hbm [shape: f32[8,128], index: 5, kind: output, shape index: {}]  }
   0x1   :  { %11 = vsyncpa [#allocation6], 0 }
   0x2   :  { %12 = vsyncpa [#allocation4], 0  ;;  %s404_s18 = smov [#allocation5]   ;;  %s310_s22 = scalar_lea.hbm %s505_s2, 768 }
   0x3   :  { %s30_s19 = sshll.u32 %s404_s18, 4  ;;  %p311_p0 = scmp.ne.s32.totalorder %s505_s2, %s310_s22  ;;  %s31_s19 = int_to_ptr.vmem [resolvable:$true] %s30_s19 }
   0x4   :  { %p314_p1 = scmp.lt.u32.totalorder %s310_s22, %s505_s2 }
   0x6   :  { %p316_p2 = pnand %p314_p1, %p311_p0 }
   0x8   :  { %319 = shalt.err (!%p316_p2)
}
   0x9   :  { %s320_s27 = scalar_lea.vmem %s31_s19, 768  ;;  %p325_p4 = scmp.lt.s32.totalorder %s31_s19, %s31_s19 }
   0xa   :  { %p321_p3 = scmp.ne.s32.totalorder %s31_s19, %s320_s27  ;;  %p326_p5 = scmp.lt.s32.totalorder %s320_s27, %s320_s27 }
   0xc   :  { %p327_p6 = por %p326_p5, %p325_p4 }
   0xe   :  { %p328_p7 = pnand %p327_p6, %p321_p3 }
  0x10   :  { %331 = shalt.err (!%p328_p7)
}
  0x11   :  { %s405_s28 = smov 128   ;;  %s406_s29 = smov 8  }
  0x12   :  { %36 = dma.hbm_to_vmem [thread:$0]  %s505_s2, 768, %s31_s19, [#allocation6], %s405_s28, %s405_s28, %s406_s29  }
  0x13   :  { %s407_s7 = smov [#allocation2]   ;;  %s408_s9 = smov [#allocation7]  }
  0x14   :  { %s19_s8 = sshll.u32 %s407_s7, 4  ;;  %s42_s10 = sshll.u32 %s408_s9, 4  ;;  %s20_s8 = int_to_ptr.vmem [resolvable:$true] %s19_s8  ;;  %s43_s10 = int_to_ptr.vmem [resolvable:$true] %s42_s10 }
  0x15   :  { %s332_s13 = scalar_lea.hbm %s503_s0, 128 }
  0x16   :  { %p333_p8 = scmp.ne.s32.totalorder %s503_s0, %s332_s13  ;;  %p336_p9 = scmp.lt.u32.totalorder %s332_s13, %s503_s0 }
  0x18   :  { %p338_p10 = pnand %p336_p9, %p333_p8 }
  0x1a   :  { %341 = shalt.err (!%p338_p10)
}
  0x1b   :  { %s342_s2 = scalar_lea.vmem %s20_s8, 128  ;;  %p347_p12 = scmp.lt.s32.totalorder %s20_s8, %s20_s8 }
  0x1c   :  { %p343_p11 = scmp.ne.s32.totalorder %s20_s8, %s342_s2  ;;  %p348_p13 = scmp.lt.s32.totalorder %s342_s2, %s342_s2 }
  0x1e   :  { %p349_p0 = por %p348_p13, %p347_p12 }
  0x20   :  { %p350_p1 = pnand %p349_p0, %p343_p11 }
  0x22   :  { %353 = shalt.err (!%p350_p1)
}
  0x23   :  { %22 = dma.hbm_to_vmem [thread:$0]  %s503_s0, 128, %s20_s8, [#allocation3]  }
  0x24   :  { %s354_s22 = scalar_lea.hbm %s506_s3, 512 }
  0x25   :  { %p355_p2 = scmp.ne.s32.totalorder %s506_s3, %s354_s22  ;;  %p358_p3 = scmp.lt.u32.totalorder %s354_s22, %s506_s3 }
  0x27   :  { %p360_p4 = pnand %p358_p3, %p355_p2 }
  0x29   :  { %363 = shalt.err (!%p360_p4)
}
  0x2a   :  { %s364_s27 = scalar_lea.vmem %s43_s10, 512  ;;  %p369_p6 = scmp.lt.s32.totalorder %s43_s10, %s43_s10 }
  0x2b   :  { %p365_p5 = scmp.ne.s32.totalorder %s43_s10, %s364_s27  ;;  %p370_p7 = scmp.lt.s32.totalorder %s364_s27, %s364_s27 }
  0x2d   :  { %p371_p8 = por %p370_p7, %p369_p6 }
  0x2f   :  { %p372_p9 = pnand %p371_p8, %p365_p5 }
  0x31   :  { %375 = shalt.err (!%p372_p9)
}
  0x32   :  { %48 = dma.hbm_to_vmem [thread:$0]  %s506_s3, 512, %s43_s10, [#allocation6], %s405_s28, %s405_s28, %s406_s29  }
  0x33   :  { %398 = dma.done.wait [#allocation3], 128  }
  0x34   :  { %399 = vsyncadd [#allocation3], 4294967168 }
  0x35   :  { %400 = dma.done.wait [#allocation6], 1280  }
  0x36   :  { %401 = vsyncadd [#allocation6], 4294966016  ;;  %v409_v0 = vmov 0.0|0.0   ;;  %vm410_vm0 = vmmov 0   ;;  %v411_v1 = vmov 0.0   ;;  %v61_v2 = vld [vmem:[#allocation5] sm:$0xff] }
  0x37   :  { %292 = vmatprep.subr.bf16.mxu1 %v409_v0  ;;  %286 = vmatprep.subr.bf16.mxu0 %v409_v0  ;;  %v62_v3 = vld [vmem:[#allocation5 + $0x8] sm:$0xff]  ;;  %v68_v4 = vld [vmem:[#allocation7] sm:$0xff]  ;;  %v69_v6 = vld [vmem:[#allocation7 + $0x8] sm:$0xff]  ;;  %vm72_vm1 = vcmask 261120   ;;  %vm146_vm2 = vcmask 392192   ;;  %s412_s7 = smov [#allocation8]  }
  0x38   :  { %268 = vmatprep.mubr.msk.f32.mxu0 %vm410_vm0, %v411_v1  ;;  %283 = vmatprep.mubr.msk.f32.mxu1 %vm410_vm0, %v411_v1  ;;  %v293_v5 = vpack.c.bf16 %v62_v3, %v61_v2  ;;  %v63_v7 = vld [vmem:[#allocation5 + $0x10] sm:$0xff]  ;;  %v64_v8 = vld [vmem:[#allocation5 + $0x18] sm:$0xff]  ;;  %v287_v9 = vpack.c.bf16 %v69_v6, %v68_v4  ;;  %v70_v10 = vld [vmem:[#allocation7 + $0x10] sm:$0xff]  ;;  %s235_s8 = sshll.u32 %s412_s7, 4  ;;  %s236_s8 = int_to_ptr.vmem [resolvable:$true] %s235_s8 }
  0x39   :  { %v71_v11 = vld [vmem:[#allocation7 + $0x18] sm:$0xff]  ;;  %v296_v12 = vpack.c.bf16 %v64_v8, %v63_v7  ;;  %v65_v14 = vld [vmem:[#allocation5 + $0x20] sm:$0xff]  ;;  %v67_v17 = vld [vmem:[%s504_s1] sm:$0xff]  ;;  %s376_s1 = scalar_lea.vmem %s236_s8, 128  ;;  %p381_p11 = scmp.lt.s32.totalorder %s236_s8, %s236_s8 }
  0x3a   :  { %294 = vmatpush3.bf16.msra.mxu1 %v293_v5  ;;  %288 = vmatpush3.bf16.msra.mxu0 %v287_v9  ;;  %v290_v13 = vpack.c.bf16 %v71_v11, %v70_v10  ;;  %v66_v15 = vld [vmem:[#allocation5 + $0x28] sm:$0xff]  ;;  %v60_v18 = vld [vmem:[#allocation2] sm:$0xff]  ;;  %p377_p10 = scmp.ne.s32.totalorder %s236_s8, %s376_s1  ;;  %p382_p12 = scmp.lt.s32.totalorder %s376_s1, %s376_s1 }
  0x3b   :  { %295 = vmatprep.subr.bf16.mxu1 %v409_v0  ;;  %289 = vmatprep.subr.bf16.mxu0 %v409_v0  ;;  %v299_v16 = vpack.c.bf16 %v66_v15, %v65_v14  ;;  %v247_v22 = vld [vmem:[%s507_s4] ss:$0 sm:$0xff] }
  0x3c   :  { %p383_p13 = por %p382_p12, %p381_p11 }
  0x3e   :  { %297 = vmatpush3.bf16.msra.mxu1 %v296_v12  ;;  %291 = vmatpush3.bf16.msra.mxu0 %v290_v13  ;;  %p384_p0 = pnand %p383_p13, %p377_p10 }
  0x3f   :  { %298 = vmatprep.subr.bf16.mxu1 %v409_v0 }
  0x41   :  { %269 = vmatmul.mubr.msk.f32.vlgmr.msra.gmra.mrb[0].mxu0 %vm72_vm1, %v67_v17 }
  0x42   :  { %300 = vmatpush3.bf16.msra.mxu1 %v299_v16 }
  0x45   :  { %284 = vmatmul.mubr.msk.f32.vlgmr.msra.gmra.mrb[0].mxu1 %vm146_vm2, %v60_v18 }
 0x114   :  { %v142_v19 = vpop.f32.mrb[0].mxu0 }
 0x115   :  { %v270_v20 = vpop.f32.mrb[1].mxu0 }
 0x118   :  { %v216_v21 = vpop.f32.mrb[0].mxu1 }
 0x119   :  { %v217_v23 = vadd.f32 %v216_v21, %v142_v19  ;;  %v285_v24 = vpop.f32.mrb[1].mxu1 }
 0x11b   :  { %v227_v25 = vadd.f32 %v247_v22, %v217_v23 }
 0x11d   :  { %228 = vst [vmem:[#allocation8] sm:$0xff] %v227_v25 }
 0x11e   :  { %387 = shalt.err (!%p384_p0)
}
 0x11f   :  { %s388_s11 = scalar_lea.hbm %s508_s5, 128 }
 0x120   :  { %p389_p1 = scmp.ne.s32.totalorder %s508_s5, %s388_s11  ;;  %p392_p2 = scmp.lt.u32.totalorder %s388_s11, %s508_s5 }
 0x122   :  { %p394_p3 = pnand %p392_p2, %p389_p1 }
 0x124   :  { %397 = shalt.err (!%p394_p3)
}
 0x125   :  { %238 = dma.vmem_to_hbm [thread:$0]  %s236_s8, 128, %s508_s5, [#allocation4]  }
 0x126   :  { %402 = dma.done.wait [#allocation4], 128  }
 0x127   :  { %403 = vsyncadd [#allocation4], 4294967168 }
 0x128   :  { %242 = vsyncpa [#allocation3], 1 }
 0x129   :  { %243 = vsyncpa [#allocation6], 1 }
 0x12a   :  { %244 = vsyncpa [#allocation4], 1 }

</bundles_post_ra>
